<compile_context>
chip_gen: v5e
topology: v5e:2x2
jax: 0.10.0
libtpu: 0.0.40
codegen_flags: <defaults>
</compile_context>

<pallas_src>
import math

import jax
import jax.numpy as jnp
from jax import lax
from jax.experimental import pallas as pl
from jax.experimental.pallas import tpu as pltpu


def _round_up(x, m):
    return ((x + m - 1) // m) * m


# ---------------- Pallas kernels ----------------

def _linear_dfa_body(x_ref, w_ref, o_ref, acc_ref, b_ref=None):
    """One (i, j, k) grid step of out = x @ W^T (+ bias).

    x_ref:   (tm, tk)  bf16   activation tile
    w_ref:   (tn, tk)  bf16   weight tile in native (out, in) layout
    b_ref:   (1, tn)   f32    bias tile (optional)
    o_ref:   (tm, tn)  out dtype
    acc_ref: (tm, tn)  f32    VMEM accumulator, resident across the K axis
    """
    k = pl.program_id(2)

    @pl.when(k == 0)
    def _():
        acc_ref[...] = jnp.zeros_like(acc_ref)

    # Contract over the shared last (in_features) dim: (tm,tk) x (tn,tk) -> (tm,tn).
    # The MXU consumes the transposed operand natively.
    acc_ref[...] += lax.dot_general(
        x_ref[...],
        w_ref[...],
        dimension_numbers=(((1,), (1,)), ((), ())),
        preferred_element_type=jnp.float32,
    )

    @pl.when(k == pl.num_programs(2) - 1)
    def _():
        res = acc_ref[...]
        if b_ref is not None:
            res = res + b_ref[...].astype(jnp.float32)  # (1, tn) broadcast over tm
        o_ref[...] = res.astype(o_ref.dtype)


def _linear_kernel(x_ref, w_ref, o_ref, acc_ref):
    _linear_dfa_body(x_ref, w_ref, o_ref, acc_ref)


def _linear_bias_kernel(x_ref, w_ref, b_ref, o_ref, acc_ref):
    _linear_dfa_body(x_ref, w_ref, o_ref, acc_ref, b_ref=b_ref)


# ---------------- Wrapper ----------------

def linear_dfa_forward(x, weight, bias=None, *, tm_max=256, tn_max=512, tk_max=512):
    """Forward pass of LinearDFA: x @ weight.T (+ bias).

    x:      (B, in_features)
    weight: (out_features, in_features)   # native PyTorch layout, never transposed
    bias:   (out_features,) or None
    returns (B, out_features) in x.dtype
    """
    B, in_f = x.shape
    out_f, in_f2 = weight.shape
    assert in_f == in_f2
    out_dtype = x.dtype

    # Tile sizes: lane-dense (multiples of 128 on the N/K lane axes),
    # sublane-aligned (multiple of 8) on M.  Caps (256, 512, 512) in bf16
    # double-buffer comfortably inside v7x's scoped VMEM and stay 128/256
    # aligned for the v5e/v6e/v7x MXUs.
    tm = min(tm_max, _round_up(B, 8))
    tn = min(tn_max, _round_up(out_f, 128))
    tk = min(tk_max, _round_up(in_f, 128))

    bp = _round_up(B, tm)
    outp = _round_up(out_f, tn)
    inp = _round_up(in_f, tk)

    # Zero-pad to tile multiples (zeros contribute nothing to the dot) and
    # cast operands to bf16 for 2x MXU rate / half the HBM traffic; the
    # accumulation stays in f32.
    x_p = jnp.pad(x.astype(jnp.bfloat16), ((0, bp - B), (0, inp - in_f)))
    w_p = jnp.pad(weight.astype(jnp.bfloat16), ((0, outp - out_f), (0, inp - in_f)))

    grid = (bp // tm, outp // tn, inp // tk)

    x_spec = pl.BlockSpec((tm, tk), lambda i, j, k: (i, k))
    w_spec = pl.BlockSpec((tn, tk), lambda i, j, k: (j, k))   # native (out, in) layout
    o_spec = pl.BlockSpec((tm, tn), lambda i, j, k: (i, j))   # fixed across K -> resident

    in_specs = [x_spec, w_spec]
    args = [x_p, w_p]
    if bias is not None:
        b_p = jnp.pad(bias.astype(jnp.float32), (0, outp - out_f)).reshape(1, outp)
        in_specs.append(pl.BlockSpec((1, tn), lambda i, j, k: (0, j)))
        args.append(b_p)
        kernel = _linear_bias_kernel
    else:
        kernel = _linear_kernel

    cost = pl.CostEstimate(
        flops=2 * B * in_f * out_f,
        transcendentals=0,
        bytes_accessed=(B * in_f + out_f * in_f) * 2          # bf16 operands
        + B * out_f * jnp.dtype(out_dtype).itemsize,          # output
    )

    out_p = pl.pallas_call(
        kernel,
        out_shape=jax.ShapeDtypeStruct((bp, outp), out_dtype),
        grid_spec=pltpu.PrefetchScalarGridSpec(
            num_scalar_prefetch=0,
            grid=grid,
            in_specs=in_specs,
            out_specs=o_spec,
            scratch_shapes=[pltpu.VMEM((tm, tn), jnp.float32)],
        ),
        compiler_params=pltpu.CompilerParams(
            dimension_semantics=("parallel", "parallel", "arbitrary"),
            vmem_limit_bytes=32 * 1024 * 1024,
        ),
        cost_estimate=cost,
    )(*args)

    return out_p[:B, :out_f]


# ---------------- Deterministic parameter init ----------------

def kaiming_uniform(key, out_features, in_features, dtype=jnp.float32):
    # torch.nn.init.kaiming_uniform_ default: gain=sqrt(2), bound=gain*sqrt(3/fan_in)
    bound = math.sqrt(2.0) * math.sqrt(3.0 / in_features)
    return jax.random.uniform(
        key, (out_features, in_features), dtype=dtype, minval=-bound, maxval=bound
    )


if __name__ == "__main__":
    # Small shapes consistent with a fully-connected DFA layer.
    batch = 8
    in_features = 32
    out_features = 16
    out_error_features = 10  # error-layer width; only used by backward

    key = jax.random.PRNGKey(0)
    k_x, k_w, k_b, k_rm = jax.random.split(key, 4)

    x = jax.random.normal(k_x, (batch, in_features), dtype=jnp.float32)

    # LinearDFA.__init__ parameter shapes:
    weight = kaiming_uniform(k_w, out_features, in_features)                # (out, in)
    random_matrix = kaiming_uniform(k_rm, out_error_features, in_features)  # backward-only
    bias = jax.random.uniform(
        k_b, (out_features,), dtype=jnp.float32, minval=-0.1, maxval=0.1
    )

    # Run the Pallas kernel: default LinearDFA has bias=None, but also
    # exercise the bias epilogue path.
    out = jax.block_until_ready(linear_dfa_forward(x, weight, None))
    out_b = jax.block_until_ready(linear_dfa_forward(x, weight, bias))

    # Reference: same bf16 operand cast the kernel uses, f32 accumulation.
    xb = x.astype(jnp.bfloat16).astype(jnp.float32)
    wb = weight.astype(jnp.bfloat16).astype(jnp.float32)
    ref = xb @ wb.T
    ref_b = ref + bias[None, :]

    assert out.shape == (batch, out_features)
    assert jnp.allclose(out, ref, atol=1e-4, rtol=1e-4)
    assert jnp.allclose(out_b, ref_b, atol=1e-4, rtol=1e-4)

    # TODO(synk): the DFA backward rule (grad_input = error_layer.grad_output @
    # random_matrix, grad_weight = grad_output.T @ input) lives in autograd and
    # is out of scope for this forward kernel.
    print("KERNEL_OK")
</pallas_src>

<mosaic_0001>
module attributes {stable_mosaic.version = 11 : i64} {
  func.func @_linear_kernel(%arg0: i32, %arg1: i32, %arg2: i32, %arg3: memref<8x128xbf16, #tpu.memory_space<vmem>>, %arg4: memref<128x128xbf16, #tpu.memory_space<vmem>>, %arg5: memref<8x128xf32, #tpu.memory_space<vmem>>, %arg6: memref<8x128xf32, #tpu.memory_space<vmem>>) attributes {dimension_semantics = [#tpu.dimension_semantics<parallel>, #tpu.dimension_semantics<parallel>, #tpu.dimension_semantics<arbitrary>], iteration_bounds = array<i64: 1, 1, 1>, scalar_prefetch = 0 : i64, scratch_operands = 1 : i64, tpu.core_type = #tpu.core_type<tc>, window_params = [{transform_indices = @transform_0, window_bounds = array<i64: 8, 128>}, {transform_indices = @transform_1, window_bounds = array<i64: 128, 128>}, {transform_indices = @transform_2, window_bounds = array<i64: 8, 128>}]} {
    %c0_i32 = arith.constant 0 : i32
    %0 = arith.cmpi eq, %arg2, %c0_i32 : i32
    %1 = arith.extui %0 : i1 to i32
    %c0_i32_0 = arith.constant 0 : i32
    %2 = arith.cmpi ne, %1, %c0_i32_0 : i32
    scf.if %2 {
      %cst_10 = arith.constant 0.000000e+00 : f32
      %12 = vector.broadcast %cst_10 : f32 to vector<8x128xf32>
      %c0_11 = arith.constant 0 : index
      %c0_12 = arith.constant 0 : index
      %13 = vector.load %arg6[%c0_11, %c0_12] : memref<8x128xf32, #tpu.memory_space<vmem>>, vector<8x128xf32>
      tpu.vector_store %arg6[%c0_11, %c0_12], %12 {strides = array<i32>} : memref<8x128xf32, #tpu.memory_space<vmem>>, vector<8x128xf32>,
    } else {
    }
    %c0 = arith.constant 0 : index
    %c0_1 = arith.constant 0 : index
    %3 = vector.load %arg6[%c0, %c0_1] : memref<8x128xf32, #tpu.memory_space<vmem>>, vector<8x128xf32>
    %c0_2 = arith.constant 0 : index
    %c0_3 = arith.constant 0 : index
    %4 = vector.load %arg3[%c0_2, %c0_3] : memref<8x128xbf16, #tpu.memory_space<vmem>>, vector<8x128xbf16>
    %c0_4 = arith.constant 0 : index
    %c0_5 = arith.constant 0 : index
    %5 = vector.load %arg4[%c0_4, %c0_5] : memref<128x128xbf16, #tpu.memory_space<vmem>>, vector<128x128xbf16>
    %cst = arith.constant dense<0.000000e+00> : vector<8x128xf32>
    %6 = tpu.matmul %4, %5, %cst {dimension_numbers = #tpu.dot_dimension_numbers<[1], [1], [0], [0], [0, 0, 1, 0], [], []>} : vector<8x128xbf16>, vector<128x128xbf16>, vector<8x128xf32> -> vector<8x128xf32>
    %7 = arith.addf %3, %6 : vector<8x128xf32>
    %c0_6 = arith.constant 0 : index
    %c0_7 = arith.constant 0 : index
    %8 = vector.load %arg6[%c0_6, %c0_7] : memref<8x128xf32, #tpu.memory_space<vmem>>, vector<8x128xf32>
    tpu.vector_store %arg6[%c0_6, %c0_7], %7 {strides = array<i32>} : memref<8x128xf32, #tpu.memory_space<vmem>>, vector<8x128xf32>,
    %c0_i32_8 = arith.constant 0 : i32
    %9 = arith.cmpi eq, %arg2, %c0_i32_8 : i32
    %10 = arith.extui %9 : i1 to i32
    %c0_i32_9 = arith.constant 0 : i32
    %11 = arith.cmpi ne, %10, %c0_i32_9 : i32
    scf.if %11 {
      %c0_10 = arith.constant 0 : index
      %c0_11 = arith.constant 0 : index
      %12 = vector.load %arg6[%c0_10, %c0_11] : memref<8x128xf32, #tpu.memory_space<vmem>>, vector<8x128xf32>
      %c0_12 = arith.constant 0 : index
      %c0_13 = arith.constant 0 : index
      %13 = vector.load %arg5[%c0_12, %c0_13] : memref<8x128xf32, #tpu.memory_space<vmem>>, vector<8x128xf32>
      tpu.vector_store %arg5[%c0_12, %c0_13], %12 {strides = array<i32>} : memref<8x128xf32, #tpu.memory_space<vmem>>, vector<8x128xf32>,
    } else {
    }
    return
  }
  func.func @transform_0(%arg0: i32, %arg1: i32, %arg2: i32) -> (i32, i32) {
    %c0_i32 = arith.constant 0 : i32
    return %arg0, %arg2 : i32, i32
  }
  func.func @transform_1(%arg0: i32, %arg1: i32, %arg2: i32) -> (i32, i32) {
    %c0_i32 = arith.constant 0 : i32
    return %arg1, %arg2 : i32, i32
  }
  func.func @transform_2(%arg0: i32, %arg1: i32, %arg2: i32) -> (i32, i32) {
    %c0_i32 = arith.constant 0 : i32
    return %arg0, %arg1 : i32, i32
  }
}

</mosaic_0001>

<bundles_post_ra>
// kernel: tpu_custom_call.1
= control target key start
LH: loop header
LB: loop body
LE: loop exit
PB: predicated region body
PF: predicated region fallthrough
CT: control target
= control target key end

     0   :  { %7 = vsyncpa [#allocation4], 0  ;;  %s303_s0 = inlined_call_operand.hbm [shape: bf16[8,128], index: 0, kind: input, shape index: {}]   ;;  %s304_s1 = inlined_call_operand.hbm [shape: bf16[128,128], index: 1, kind: input, shape index: {}]   ;;  %s305_s2 = inlined_call_operand.hbm [shape: f32[8,128], index: 2, kind: output, shape index: {}]  }
   0x1   :  { %8 = vsyncpa [#allocation7], 0 }
   0x2   :  { %9 = vsyncpa [#allocation5], 0  ;;  %s15_s11 = sshll.u32 %s303_s0, 4  ;;  %s274_s12 = smov [#allocation3]   ;;  %s16_s11 = int_to_ptr.hbm [resolvable:$true] %s15_s11 }
   0x3   :  { %s17_s13 = sshll.u32 %s274_s12, 4  ;;  %s25_s16 = sshll.u32 %s304_s1, 4  ;;  %s18_s13 = int_to_ptr.vmem [resolvable:$true] %s17_s13  ;;  %s26_s16 = int_to_ptr.hbm [resolvable:$true] %s25_s16 }
   0x4   :  { %20 = dma.hbm_to_vmem [thread:$0]  %s16_s11, 64, %s18_s13, [#allocation4]  }
   0x5   :  { %s275_s17 = smov [#allocation6]   ;;  %s276_s19 = smov 64  }
   0x6   :  { %s27_s18 = sshll.u32 %s275_s17, 4  ;;  %s277_s20 = smov 4   ;;  %s28_s18 = int_to_ptr.vmem [resolvable:$true] %s27_s18 }
   0x7   :  { %33 = dma.hbm_to_vmem [thread:$0]  %s26_s16, 1024, %s28_s18, [#allocation7], %s276_s19, %s276_s19, %s277_s20  }
   0x8   :  { %268 = dma.done.wait [#allocation4], 64  }
   0x9   :  { %269 = vsyncadd [#allocation4], 4294967232 }
   0xa   :  { %270 = dma.done.wait [#allocation7], 1024  }
   0xb   :  { %271 = vsyncadd [#allocation7], 4294966272  ;;  %v190_v0 = vld [vmem:[#allocation6 + $0x38] sm:$0xff]  ;;  %v189_v1 = vld [vmem:[#allocation6 + $0x30] sm:$0xff]  ;;  %s278_s0 = smov [#allocation8]   ;;  %s140_s23 = sshll.u32 %s305_s2, 4  ;;  %s141_s23 = int_to_ptr.hbm [resolvable:$true] %s140_s23 }
   0xc   :  { %113 = vmatpush.bf16.xpose.msra.mxu0 %v190_v0  ;;  %v188_v2 = vld [vmem:[#allocation6 + $0x28] sm:$0xff]  ;;  %v187_v3 = vld [vmem:[#allocation6 + $0x20] sm:$0xff]  ;;  %v186_v4 = vld [vmem:[#allocation6 + $0x18] sm:$0xff]  ;;  %s138_s1 = sshll.u32 %s278_s0, 4  ;;  %s139_s1 = int_to_ptr.vmem [resolvable:$true] %s138_s1 }
   0xd   :  { %v185_v5 = vld [vmem:[#allocation6 + $0x10] sm:$0xff]  ;;  %v184_v6 = vld [vmem:[#allocation6 + $0x8] sm:$0xff]  ;;  %v183_v7 = vld [vmem:[#allocation6] sm:$0xff] }
   0xe   :  { %v48_v8 = vld [vmem:[#allocation3] sm:$0xf] }
  0x14   :  { %114 = vmatpush.bf16.xpose.msra.mxu0 %v189_v1 }
  0x1c   :  { %115 = vmatpush.bf16.xpose.msra.mxu0 %v188_v2 }
  0x24   :  { %116 = vmatpush.bf16.xpose.msra.mxu0 %v187_v3 }
  0x2c   :  { %117 = vmatpush.bf16.xpose.msra.mxu0 %v186_v4 }
  0x34   :  { %118 = vmatpush.bf16.xpose.msra.mxu0 %v185_v5 }
  0x3c   :  { %119 = vmatpush.bf16.xpose.msra.mxu0 %v184_v6 }
  0x44   :  { %120 = vmatpush.bf16.xpose.msra.mxu0 %v183_v7 }
  0x4b   :  { %121 = vmatmul.bf16.vlgmr.msra.gmra.mxu0 %v48_v8 }
  0xc8   :  { %v122_v9 = vpop.f32.mrf.mxu0 }
  0xc9   :  { %132 = vst [vmem:[#allocation8] sm:$0xff] %v122_v9 }
  0xca   :  { %143 = dma.vmem_to_hbm [thread:$0]  %s139_s1, 128, %s141_s23, [#allocation5]  }
  0xd0   :  { %v124_v10 = vpop.f32.mrf.mxu0 }
  0xd1   :  { %272 = dma.done.wait [#allocation5], 128  }
  0xd2   :  { %273 = vsyncadd [#allocation5], 4294967168 }
  0xd3   :  { %148 = vsyncpa [#allocation4], 1 }
  0xd4   :  { %149 = vsyncpa [#allocation7], 1 }
  0xd5   :  { %150 = vsyncpa [#allocation5], 1 }

</bundles_post_ra>
